<compile_context>
chip_gen: v6e
topology: v6e:2x2x1
jax: 0.10.0
libtpu: 0.0.40
codegen_flags: <defaults>
</compile_context>

<pallas_src>
import math

import jax
import jax.numpy as jnp
from jax.experimental import pallas as pl
from jax.experimental.pallas import tpu as pltpu

_MIN = 1e-5
_MAX = 1e6
_LOG_MIN = math.log(_MIN)   # ~ -11.5129
_LOG_MAX = math.log(_MAX)   # ~  13.8155


def _mean_act_kernel(x_ref, o_ref):
    # Whole-tile load -> VPU clamp -> EUP exp -> VPU clamp -> whole-tile store.
    x = x_ref[...].astype(jnp.float32)
    # Clamp in log-space first so exp never overflows to inf (safer under autodiff),
    # then clamp the result to the exact bounds required by MeanAct.
    y = jnp.exp(jnp.clip(x, _LOG_MIN, _LOG_MAX))
    y = jnp.clip(y, _MIN, _MAX)
    o_ref[...] = y.astype(o_ref.dtype)


def _round_up(v: int, m: int) -> int:
    return -(-v // m) * m


def mean_act(x, *, block_rows: int = 256, block_cols: int = 512):
    """MeanAct forward: clamp(exp(x), 1e-5, 1e6), elementwise, any shape."""
    orig_shape = x.shape
    orig_dtype = x.dtype

    # Flatten to 2-D (rows, lanes): last dim -> lane axis, everything else -> rows.
    if x.ndim == 0:
        x2 = x.reshape(1, 1)
    elif x.ndim == 1:
        x2 = x.reshape(1, -1)
    else:
        x2 = x.reshape(-1, orig_shape[-1])
    M, N = x2.shape

    # Lane-/sublane-aligned tile sizes, capped at the requested block size.
    tm = min(block_rows, _round_up(M, 8))
    tn = min(block_cols, _round_up(N, 128))

    # Pad so the grid covers the array with full, lane-dense tiles (unmasked stores).
    Mp = _round_up(M, tm)
    Np = _round_up(N, tn)
    if (Mp, Np) != (M, N):
        x2 = jnp.pad(x2, ((0, Mp - M), (0, Np - N)))

    grid = (Mp // tm, Np // tn)

    out = pl.pallas_call(
        _mean_act_kernel,
        out_shape=jax.ShapeDtypeStruct((Mp, Np), orig_dtype),
        grid=grid,
        in_specs=[pl.BlockSpec((tm, tn), lambda i, j: (i, j))],
        out_specs=pl.BlockSpec((tm, tn), lambda i, j: (i, j)),
        compiler_params=pltpu.CompilerParams(
            dimension_semantics=("parallel", "parallel"),
            vmem_limit_bytes=64 * 1024 * 1024,
        ),
    )(x2)

    out = out[:M, :N]
    return out.reshape(orig_shape)


def _reference(x):
    return jnp.clip(jnp.exp(x), _MIN, _MAX)


if __name__ == "__main__":
    key = jax.random.PRNGKey(0)
    k1, k2 = jax.random.split(key)

    # Small shape consistent with the module: MeanAct is applied to the decoder's
    # (batch, genes) mean head — use batch=8, features=256.
    B, G = 8, 256
    x = jax.random.normal(k1, (B, G), jnp.float32) * 8.0  # wide range to exercise both clamps

    y = jax.block_until_ready(mean_act(x))
    y_ref = _reference(x)

    assert y.shape == (B, G)
    assert bool(jnp.all(jnp.isfinite(y)))
    assert bool(jnp.all(y >= _MIN)) and bool(jnp.all(y <= _MAX))
    assert bool(jnp.allclose(y, y_ref, rtol=1e-5, atol=1e-6))

    # Also check an unaligned shape to exercise the padding / lane-dense path.
    x2 = jax.random.normal(k2, (5, 200), jnp.float32) * 30.0  # triggers the max clamp via exp overflow range
    y2 = jax.block_until_ready(mean_act(x2))
    y2_ref = _reference(x2)
    assert y2.shape == (5, 200)
    assert bool(jnp.all(jnp.isfinite(y2)))
    assert bool(jnp.allclose(y2, y2_ref, rtol=1e-5, atol=1e-6))

    print("KERNEL_OK")
</pallas_src>

<mosaic_0001>
module attributes {stable_mosaic.version = 11 : i64} {
  func.func @_mean_act_kernel(%arg0: i32, %arg1: i32, %arg2: memref<8x256xf32, #tpu.memory_space<vmem>>, %arg3: memref<8x256xf32, #tpu.memory_space<vmem>>) attributes {dimension_semantics = [#tpu.dimension_semantics<parallel>, #tpu.dimension_semantics<parallel>], iteration_bounds = array<i64: 1, 1>, scalar_prefetch = 0 : i64, scratch_operands = 0 : i64, tpu.core_type = #tpu.core_type<tc>, window_params = [{transform_indices = @transform_0, window_bounds = array<i64: 8, 256>}, {transform_indices = @transform_1, window_bounds = array<i64: 8, 256>}]} {
    %c0 = arith.constant 0 : index
    %c0_0 = arith.constant 0 : index
    %0 = vector.load %arg2[%c0, %c0_0] : memref<8x256xf32, #tpu.memory_space<vmem>>, vector<8x256xf32>
    %cst = arith.constant -11.5129251 : f32
    %cst_1 = arith.constant 13.8155107 : f32
    %1 = vector.broadcast %cst : f32 to vector<8x256xf32>
    %2 = arith.maximumf %1, %0 : vector<8x256xf32>
    %3 = vector.broadcast %cst_1 : f32 to vector<8x256xf32>
    %4 = arith.minimumf %3, %2 : vector<8x256xf32>
    %5 = math.exp %4 : vector<8x256xf32>
    %cst_2 = arith.constant 9.99999974E-6 : f32
    %cst_3 = arith.constant 1.000000e+06 : f32
    %6 = vector.broadcast %cst_2 : f32 to vector<8x256xf32>
    %7 = arith.maximumf %6, %5 : vector<8x256xf32>
    %8 = vector.broadcast %cst_3 : f32 to vector<8x256xf32>
    %9 = arith.minimumf %8, %7 : vector<8x256xf32>
    %c0_4 = arith.constant 0 : index
    %c0_5 = arith.constant 0 : index
    %10 = vector.load %arg3[%c0_4, %c0_5] : memref<8x256xf32, #tpu.memory_space<vmem>>, vector<8x256xf32>
    tpu.vector_store %arg3[%c0_4, %c0_5], %9 {strides = array<i32>} : memref<8x256xf32, #tpu.memory_space<vmem>>, vector<8x256xf32>,
    return
  }
  func.func @transform_0(%arg0: i32, %arg1: i32) -> (i32, i32) {
    %c0_i32 = arith.constant 0 : i32
    return %arg0, %arg1 : i32, i32
  }
  func.func @transform_1(%arg0: i32, %arg1: i32) -> (i32, i32) {
    %c0_i32 = arith.constant 0 : i32
    return %arg0, %arg1 : i32, i32
  }
}

</mosaic_0001>

<bundles_post_ra>
// kernel: tpu_custom_call.1
= control target key start
LH: loop header
LB: loop body
LE: loop exit
PB: predicated region body
PF: predicated region fallthrough
CT: control target
= control target key end

     0   :  { %6 = vsyncpa [#allocation3], 0  ;;  %s120_s0 = inlined_call_operand.hbm [shape: f32[8,256], index: 0, kind: input, shape index: {}]   ;;  %s121_s1 = inlined_call_operand.hbm [shape: f32[8,256], index: 1, kind: output, shape index: {}]  }
   0x1   :  { %7 = vsyncpa [#allocation4], 0  ;;  %s102_s6 = smov [#allocation2]  }
   0x2   :  { %s14_s7 = sshll.u32 %s102_s6, 4  ;;  %s15_s7 = int_to_ptr.vmem [resolvable:$true] %s14_s7 }
   0x3   :  { %s66_s8 = scalar_lea.vmem %s15_s7, 256  ;;  %p71_p1 = scmp.lt.s32.totalorder %s15_s7, %s15_s7 }
   0x4   :  { %p67_p0 = scmp.ne.s32.totalorder %s15_s7, %s66_s8  ;;  %p72_p2 = scmp.lt.s32.totalorder %s66_s8, %s66_s8 }
   0x6   :  { %p73_p3 = por %p72_p2, %p71_p1 }
   0x8   :  { %p74_p4 = pnand %p73_p3, %p67_p0 }
   0xa   :  { %77 = shalt.err (!%p74_p4)
}
   0xb   :  { %17 = dma.hbm_to_vmem [thread:$0]  %s120_s0, 256, %s15_s7, [#allocation3]  }
   0xc   :  { %98 = dma.done.wait [#allocation3], 256  }
   0xd   :  { %99 = vsyncadd [#allocation3], 4294967040  ;;  %v21_v0 = vld [vmem:[#allocation2] sm:$0xff]  ;;  %v22_v1 = vld [vmem:[#allocation2 + $0x8] sm:$0xff]  ;;  %s103_s11 = smov [#allocation5]  }
   0xe   :  { %v23_v2 = vmax.f32 %v21_v0, -11.512925  ;;  %v24_v3 = vmax.f32 %v22_v1, -11.512925  ;;  %s43_s12 = sshll.u32 %s103_s11, 4  ;;  %s44_s12 = int_to_ptr.vmem [resolvable:$true] %s43_s12 }
   0xf   :  { %s78_s0 = scalar_lea.vmem %s44_s12, 256  ;;  %p83_p6 = scmp.lt.s32.totalorder %s44_s12, %s44_s12 }
  0x10   :  { %v25_v4 = vmin.f32 %v23_v2, 13.815511  ;;  %v26_v5 = vmin.f32 %v24_v3, 13.815511  ;;  %p79_p5 = scmp.ne.s32.totalorder %s44_s12, %s78_s0  ;;  %p84_p7 = scmp.lt.s32.totalorder %s78_s0, %s78_s0 }
  0x12   :  { %v27_v6 = vmul.f32 1.442695, %v25_v4  ;;  %v29_v7 = vmul.f32 1.442695, %v26_v5  ;;  %p85_p8 = por %p84_p7, %p83_p6 }
  0x14   :  { %54 = vpow2.f32 %v27_v6  ;;  %p86_p9 = pnand %p85_p8, %p79_p5 }
  0x15   :  { %56 = vpow2.f32 %v29_v7 }
  0x21   :  { %v55_v8 = vpop.eup %54 }
  0x22   :  { %v57_v9 = vpop.eup %56  ;;  %v31_v10 = vmax.f32 %v55_v8, 1e-05 }
  0x23   :  { %v32_v11 = vmax.f32 %v57_v9, 1e-05 }
  0x24   :  { %v33_v12 = vmin.f32 %v31_v10, 1000000.0 }
  0x25   :  { %v34_v13 = vmin.f32 %v32_v11, 1000000.0 }
  0x26   :  { %35 = vst [vmem:[#allocation5] sm:$0xff] %v33_v12 }
  0x27   :  { %36 = vst [vmem:[#allocation5 + $0x8] sm:$0xff] %v34_v13 }
  0x28   :  { %89 = shalt.err (!%p86_p9)
}
  0x29   :  { %46 = dma.vmem_to_hbm [thread:$0]  %s44_s12, 256, %s121_s1, [#allocation4]  }
  0x2a   :  { %100 = dma.done.wait [#allocation4], 256  }
  0x2b   :  { %101 = vsyncadd [#allocation4], 4294967040 }
  0x2c   :  { %50 = vsyncpa [#allocation3], 1 }
  0x2d   :  { %51 = vsyncpa [#allocation4], 1 }

</bundles_post_ra>
